<compile_context>
chip_gen: v7x
topology: tpu7x:2x2x1
jax: 0.10.0
libtpu: 0.0.40
codegen_flags: <defaults>
</compile_context>

<pallas_src>
import math
import numpy as np
import jax
import jax.numpy as jnp
from jax import lax
from jax.experimental import pallas as pl
from jax.experimental.pallas import tpu as pltpu

# ---------------- model config (combine_qkv=False, rope, RMSNorm, GQA groups=2) ---------------
HIDDEN = 32
NUM_HEADS = 4
NUM_KV_HEADS = 2
HEAD_DIM = HIDDEN // NUM_HEADS            # 8
N_REP = NUM_HEADS // NUM_KV_HEADS         # 2
INTERMEDIATE = 64
EPS = 1e-6
ATTN_SCALE = math.sqrt(HEAD_DIM)

# static problem sizes baked into the (single-invocation) kernel
B = 2          # batch
QLEN = 8       # new tokens
CACHE = 8      # past (cache) length
TOTAL = CACHE + QLEN
NTOK = B * QLEN
Z = B * NUM_KV_HEADS                      # 4 batched (batch, kv-group) attention problems

KW = NUM_KV_HEADS * HEAD_DIM              # 16
QKW = HIDDEN + KW                         # 48  -> [q | k]
QKVW = QKW + KW                           # 64  -> [q | k | v]
FUSED_W = QKVW + HIDDEN + KW              # 112 -> [q | k | v | rot(q) | rot(k)]

# packed-operand geometry
ACT_W = HIDDEN + 2 * QKW                  # 128 -> [hs | cos_qk | sin_qk]
OUT_W = HIDDEN + 2 * KW                   # 64  -> [hidden_out | new K | new V]
WSLAB_LANES = 448                         # 128-aligned segments: qkv | wo | gate|up | down


# =====================================================================================
# kernel
# =====================================================================================
def decoder_layer_kernel(act_ref, mask_ref, pkv_ref, wslab_ref, vec_ref, out_ref):
    # ---- unpack packed operands (static slices) ----
    x   = act_ref[:, :HIDDEN]                                  # (NTOK, 32) residual stream
    cos = act_ref[:, HIDDEN:HIDDEN + QKW]                      # (NTOK, 48), q part pre-scaled 1/sqrt(D)
    sin = act_ref[:, HIDDEN + QKW:]                            # (NTOK, 48)

    w_in   = vec_ref[0:1, :HIDDEN]
    b_qkv  = vec_ref[1:2, :FUSED_W]
    bo     = vec_ref[2:3, :HIDDEN]
    w_post = vec_ref[3:4, :HIDDEN]
    b_gu   = vec_ref[4:5, :2 * INTERMEDIATE]
    bd     = vec_ref[5:6, :HIDDEN]

    w_qkv = wslab_ref[:HIDDEN, :FUSED_W]                       # (32, 112)
    wo_t  = wslab_ref[:HIDDEN, 128:128 + HIDDEN]               # (32, 32)
    w_gu  = wslab_ref[:HIDDEN, 256:256 + 2 * INTERMEDIATE]     # (32, 128)
    wd_t  = wslab_ref[:, 384:384 + HIDDEN]                     # (64, 32)

    # ---- input RMSNorm ----
    var = jnp.mean(x * x, axis=-1, keepdims=True)
    xn = x * lax.rsqrt(var + EPS) * w_in

    # ---- one fused projection [q | k | v | rot(q) | rot(k)] + RoPE as pure elementwise math ----
    proj = jnp.dot(xn, w_qkv, preferred_element_type=jnp.float32) + b_qkv
    qk = proj[:, :QKW] * cos + proj[:, QKVW:] * sin
    q_e = qk[:, :HIDDEN]              # (NTOK, 32), already scaled by 1/sqrt(D)
    k_e = qk[:, HIDDEN:]              # (NTOK, 16), roped keys
    v_e = proj[:, QKW:QKVW]           # (NTOK, 16)

    # ---- assemble z = (batch, kv-group) batched operands once ----
    q_z = jnp.stack([
        jnp.concatenate(
            [q_e[b * QLEN:(b + 1) * QLEN,
                 (g * N_REP + r) * HEAD_DIM:(g * N_REP + r + 1) * HEAD_DIM]
             for r in range(N_REP)], axis=0)
        for b in range(B) for g in range(NUM_KV_HEADS)], axis=0)         # (Z, N_REP*Q, D)
    k_new = jnp.stack([
        k_e[b * QLEN:(b + 1) * QLEN, g * HEAD_DIM:(g + 1) * HEAD_DIM]
        for b in range(B) for g in range(NUM_KV_HEADS)], axis=0)          # (Z, Q, D)
    v_new = jnp.stack([
        v_e[b * QLEN:(b + 1) * QLEN, g * HEAD_DIM:(g + 1) * HEAD_DIM]
        for b in range(B) for g in range(NUM_KV_HEADS)], axis=0)

    k_all = jnp.concatenate([pkv_ref[0], k_new], axis=1)                  # (Z, T, D)
    v_all = jnp.concatenate([pkv_ref[1], v_new], axis=1)

    # ---- single batched score matmul + single softmax + single batched PV matmul ----
    s = jnp.einsum('zqd,zkd->zqk', q_z, k_all,
                   preferred_element_type=jnp.float32) + mask_ref[...]    # (Z, N_REP*Q, T)
    m = jnp.max(s, axis=-1, keepdims=True)
    e = jnp.exp(s - m)
    p = e * pl.reciprocal(jnp.sum(e, axis=-1, keepdims=True), approx=True)
    o_z = jnp.einsum('zqk,zkd->zqd', p, v_all,
                     preferred_element_type=jnp.float32)                  # (Z, N_REP*Q, D)

    # ---- back to (token, hidden) layout + o_proj ----
    attn = jnp.concatenate([
        jnp.concatenate(
            [o_z[b * NUM_KV_HEADS + g, r * QLEN:(r + 1) * QLEN, :]
             for g in range(NUM_KV_HEADS) for r in range(N_REP)], axis=-1)
        for b in range(B)], axis=0)                                       # (NTOK, 32)
    attn = jnp.dot(attn, wo_t, preferred_element_type=jnp.float32) + bo

    # ---- residual + post-attention RMSNorm + fused SiLU-gated MLP + residual ----
    h1 = x + attn
    var2 = jnp.mean(h1 * h1, axis=-1, keepdims=True)
    h1n = h1 * lax.rsqrt(var2 + EPS) * w_post

    gu = jnp.dot(h1n, w_gu, preferred_element_type=jnp.float32) + b_gu
    gate = gu[:, :INTERMEDIATE]
    up = gu[:, INTERMEDIATE:]
    sig = pl.reciprocal(1.0 + jnp.exp(-gate), approx=True)
    down = jnp.dot(gate * sig * up, wd_t, preferred_element_type=jnp.float32) + bd

    # ---- single packed store: [hidden_out | new roped K | new V] (past cache not re-written) ----
    out_ref[...] = jnp.concatenate([h1 + down, k_e, v_e], axis=-1)


# =====================================================================================
# one-time parameter folding (called once at model init, NOT per forward)
# =====================================================================================
def _rotate_half_matrix(d):
    """R such that t @ R == rotate_half(t) == concat(-t[d/2:], t[:d/2])."""
    half = d // 2
    r = np.zeros((d, d), dtype=np.float32)
    r[half:, :half] = -np.eye(half, dtype=np.float32)
    r[:half, half:] = np.eye(half, dtype=np.float32)
    return r


def prepare_params(params):
    (w_in, wq, bq, wk, bk, wv, bv, wo, bo,
     w_post, wg, bg, wu, bu, wd, bd) = params

    # fold rotate_half into the projection weights (rotate_half is linear)
    r_q = jnp.asarray(np.kron(np.eye(NUM_HEADS, dtype=np.float32), _rotate_half_matrix(HEAD_DIM)))
    r_k = jnp.asarray(np.kron(np.eye(NUM_KV_HEADS, dtype=np.float32), _rotate_half_matrix(HEAD_DIM)))
    wq_t, wk_t, wv_t = wq.T, wk.T, wv.T
    w_qkv = jnp.concatenate([wq_t, wk_t, wv_t, wq_t @ r_q, wk_t @ r_k], axis=1)   # (32, 112)
    b_qkv = jnp.concatenate([bq, bk, bv, bq @ r_q, bk @ r_k])                      # (112,)
    w_gu = jnp.concatenate([wg.T, wu.T], axis=1)                                   # (32, 128)
    b_gu = jnp.concatenate([bg, bu])                                               # (128,)

    # one 128-lane-aligned weight slab: [ w_qkv | wo^T | w_gate|up | w_down^T ]
    wslab = jnp.zeros((2 * HIDDEN, WSLAB_LANES), jnp.float32)
    wslab = wslab.at[:HIDDEN, 0:FUSED_W].set(w_qkv)
    wslab = wslab.at[:HIDDEN, 128:128 + HIDDEN].set(wo.T)
    wslab = wslab.at[:HIDDEN, 256:256 + 2 * INTERMEDIATE].set(w_gu)
    wslab = wslab.at[:, 384:384 + HIDDEN].set(wd.T)

    # one vreg-sized (8,128) slab with all biases / norm weights
    vec = jnp.zeros((8, 128), jnp.float32)
    vec = vec.at[0, :HIDDEN].set(w_in)
    vec = vec.at[1, :FUSED_W].set(b_qkv)
    vec = vec.at[2, :HIDDEN].set(bo)
    vec = vec.at[3, :HIDDEN].set(w_post)
    vec = vec.at[4, :2 * INTERMEDIATE].set(b_gu)
    vec = vec.at[5, :HIDDEN].set(bd)
    return wslab, vec


# =====================================================================================
# forward wrapper (jitted; only tiny activation reshapes happen per call)
# =====================================================================================
def _full_spec(shape):
    nd = len(shape)
    return pl.BlockSpec(shape, lambda i, _nd=nd: (0,) * _nd)


@jax.jit
def decoder_layer_forward(hidden_states, mask, pos_emb, past_key, past_value, wslab, vec):
    Bsz, Q, H = hidden_states.shape
    KV, C = past_key.shape[1], past_key.shape[2]
    T = C + Q
    assert (Bsz, Q, H, KV, C) == (B, QLEN, HIDDEN, NUM_KV_HEADS, CACHE)

    # --- activation slab: [hs | cos_qk | sin_qk], q cos/sin pre-scaled by 1/sqrt(D) ---
    hs_flat = hidden_states.reshape(NTOK, HIDDEN)
    cos = pos_emb[:, 0]                                    # (B, Q, D)
    sin = pos_emb[:, 1]
    inv_scale = 1.0 / ATTN_SCALE
    cos_qk = jnp.concatenate([jnp.tile(cos, (1, 1, NUM_HEADS)) * inv_scale,
                              jnp.tile(cos, (1, 1, NUM_KV_HEADS))], axis=-1).reshape(NTOK, QKW)
    sin_qk = jnp.concatenate([jnp.tile(sin, (1, 1, NUM_HEADS)) * inv_scale,
                              jnp.tile(sin, (1, 1, NUM_KV_HEADS))], axis=-1).reshape(NTOK, QKW)
    act = jnp.concatenate([hs_flat, cos_qk, sin_qk], axis=-1)            # (NTOK, 128)

    # --- mask pre-tiled for the z=(batch, kv-group) batched layout ---
    mask_z = jnp.broadcast_to(mask[:, 0][:, None, None, :, :],
                              (B, NUM_KV_HEADS, N_REP, Q, T)).reshape(Z, N_REP * Q, T)

    # --- past K/V packed into one operand ---
    past_kv = jnp.stack([past_key.reshape(Z, C, HEAD_DIM),
                         past_value.reshape(Z, C, HEAD_DIM)], axis=0)    # (2, Z, C, D)

    inputs = (act, mask_z, past_kv, wslab, vec)

    out_slab = pl.pallas_call(
        decoder_layer_kernel,
        out_shape=jax.ShapeDtypeStruct((NTOK, OUT_W), jnp.float32),
        grid_spec=pltpu.PrefetchScalarGridSpec(
            num_scalar_prefetch=0,
            grid=(1,),                       # single step: whole layer fits in VMEM
            in_specs=[_full_spec(a.shape) for a in inputs],
            out_specs=_full_spec((NTOK, OUT_W)),
        ),
        compiler_params=pltpu.CompilerParams(
            dimension_semantics=("arbitrary",)),
    )(*inputs)

    # --- unpack output slab; roll the sliding-window cache outside the kernel ---
    hout = out_slab[:, :HIDDEN].reshape(Bsz, Q, HIDDEN)
    k_new = out_slab[:, HIDDEN:HIDDEN + KW].reshape(Bsz, Q, KV, HEAD_DIM).transpose(0, 2, 1, 3)
    v_new = out_slab[:, HIDDEN + KW:].reshape(Bsz, Q, KV, HEAD_DIM).transpose(0, 2, 1, 3)
    k_out = jnp.concatenate([past_key, k_new], axis=2)[:, :, Q:, :]
    v_out = jnp.concatenate([past_value, v_new], axis=2)[:, :, Q:, :]
    return hout, k_out, v_out


# =====================================================================================
# pure-JAX reference (mirror of the PyTorch DecoderLayer forward)
# =====================================================================================
def reference_forward(hidden_states, mask, pos_emb, past_key, past_value, params):
    (w_in, wq, bq, wk, bk, wv, bv, wo, bo,
     w_post, wg, bg, wu, bu, wd, bd) = params
    Bsz, Q, H = hidden_states.shape
    D = HEAD_DIM

    def rmsnorm(x, w):
        var = jnp.mean(x * x, axis=-1, keepdims=True)
        return x * lax.rsqrt(var + EPS) * w

    residual = hidden_states
    x = rmsnorm(hidden_states, w_in)

    q = (x @ wq.T + bq).reshape(Bsz, Q, NUM_HEADS, D).transpose(0, 2, 1, 3)
    k = (x @ wk.T + bk).reshape(Bsz, Q, NUM_KV_HEADS, D).transpose(0, 2, 1, 3)
    v = (x @ wv.T + bv).reshape(Bsz, Q, NUM_KV_HEADS, D).transpose(0, 2, 1, 3)

    cos = pos_emb[:, 0:1]
    sin = pos_emb[:, 1:2]

    def rot(t):
        t1 = t[..., :D // 2]
        t2 = t[..., D // 2:]
        return jnp.concatenate([-t2, t1], axis=-1)

    q = q * cos + rot(q) * sin
    k = k * cos + rot(k) * sin

    k = jnp.concatenate([past_key, k], axis=2)
    v = jnp.concatenate([past_value, v], axis=2)
    kout = k[:, :, Q:, :]
    vout = v[:, :, Q:, :]

    kr = jnp.repeat(k, N_REP, axis=1)
    vr = jnp.repeat(v, N_REP, axis=1)
    scores = jnp.einsum('bhqd,bhkd->bhqk', q, kr) / ATTN_SCALE + mask
    p = jax.nn.softmax(scores, axis=-1)
    o = jnp.einsum('bhqk,bhkd->bhqd', p, vr)
    attn_out = o.transpose(0, 2, 1, 3).reshape(Bsz, Q, H) @ wo.T + bo

    h = residual + attn_out
    hn = rmsnorm(h, w_post)
    gate = hn @ wg.T + bg
    up = hn @ wu.T + bu
    down = (gate * jax.nn.sigmoid(gate) * up) @ wd.T + bd
    return h + down, kout, vout


if __name__ == "__main__":
    key = jax.random.PRNGKey(0)
    keys = jax.random.split(key, 20)

    # DecoderLayer parameters (nn.Linear convention: weight (out, in), bias (out,))
    w_in = 1.0 + 0.1 * jax.random.normal(keys[0], (HIDDEN,), jnp.float32)
    wq = 0.05 * jax.random.normal(keys[1], (NUM_HEADS * HEAD_DIM, HIDDEN), jnp.float32)
    bq = 0.01 * jax.random.normal(keys[2], (NUM_HEADS * HEAD_DIM,), jnp.float32)
    wk = 0.05 * jax.random.normal(keys[3], (NUM_KV_HEADS * HEAD_DIM, HIDDEN), jnp.float32)
    bk = 0.01 * jax.random.normal(keys[4], (NUM_KV_HEADS * HEAD_DIM,), jnp.float32)
    wv = 0.05 * jax.random.normal(keys[5], (NUM_KV_HEADS * HEAD_DIM, HIDDEN), jnp.float32)
    bv = 0.01 * jax.random.normal(keys[6], (NUM_KV_HEADS * HEAD_DIM,), jnp.float32)
    wo = 0.05 * jax.random.normal(keys[7], (HIDDEN, NUM_HEADS * HEAD_DIM), jnp.float32)
    bo = 0.01 * jax.random.normal(keys[8], (HIDDEN,), jnp.float32)
    w_post = 1.0 + 0.1 * jax.random.normal(keys[9], (HIDDEN,), jnp.float32)
    wg = 0.05 * jax.random.normal(keys[10], (INTERMEDIATE, HIDDEN), jnp.float32)
    bg = 0.01 * jax.random.normal(keys[11], (INTERMEDIATE,), jnp.float32)
    wu = 0.05 * jax.random.normal(keys[12], (INTERMEDIATE, HIDDEN), jnp.float32)
    bu = 0.01 * jax.random.normal(keys[13], (INTERMEDIATE,), jnp.float32)
    wd = 0.05 * jax.random.normal(keys[14], (HIDDEN, INTERMEDIATE), jnp.float32)
    bd = 0.01 * jax.random.normal(keys[15], (HIDDEN,), jnp.float32)
    params = (w_in, wq, bq, wk, bk, wv, bv, wo, bo, w_post, wg, bg, wu, bu, wd, bd)

    hidden_states = jax.random.normal(keys[16], (B, QLEN, HIDDEN), jnp.float32)
    past_key = jax.random.normal(keys[17], (B, NUM_KV_HEADS, CACHE, HEAD_DIM), jnp.float32)
    past_value = jax.random.normal(keys[18], (B, NUM_KV_HEADS, CACHE, HEAD_DIM), jnp.float32)

    # causal additive mask: query i sits at absolute position CACHE+i, attends to keys <= CACHE+i
    qpos = CACHE + jnp.arange(QLEN)[:, None]
    kpos = jnp.arange(TOTAL)[None, :]
    mask2d = jnp.where(kpos <= qpos, 0.0, -1e9).astype(jnp.float32)
    mask = jnp.broadcast_to(mask2d, (B, 1, QLEN, TOTAL))

    # RoPE cos/sin for absolute positions CACHE..CACHE+QLEN-1
    inv_freq = 1.0 / (10000.0 ** (jnp.arange(0, HEAD_DIM, 2, dtype=jnp.float32) / HEAD_DIM))
    positions = (CACHE + jnp.arange(QLEN, dtype=jnp.float32))[:, None]
    angles = positions * inv_freq[None, :]
    emb = jnp.concatenate([angles, angles], axis=-1)          # (QLEN, HEAD_DIM)
    cos = jnp.broadcast_to(jnp.cos(emb), (B, 1, QLEN, HEAD_DIM))
    sin = jnp.broadcast_to(jnp.sin(emb), (B, 1, QLEN, HEAD_DIM))
    pos_emb = jnp.concatenate([cos, sin], axis=1)             # (B, 2, QLEN, HEAD_DIM)

    # one-time weight folding / packing (hoisted out of the per-call path)
    wslab, vec = prepare_params(params)

    out, k_out, v_out = decoder_layer_forward(
        hidden_states, mask, pos_emb, past_key, past_value, wslab, vec)
    jax.block_until_ready((out, k_out, v_out))

    ref_out, ref_k, ref_v = reference_forward(
        hidden_states, mask, pos_emb, past_key, past_value, params)
    # hidden-state tolerance widened slightly (5e-4) to accommodate the EUP approx reciprocals
    assert jnp.allclose(out, ref_out, atol=5e-4), "hidden_states output mismatch"
    assert jnp.allclose(k_out, ref_k, atol=1e-4), "key cache mismatch"
    assert jnp.allclose(v_out, ref_v, atol=1e-4), "value cache mismatch"

    print("KERNEL_OK")
</pallas_src>

<mosaic_0001>
module attributes {stable_mosaic.version = 11 : i64} {
  func.func @decoder_layer_kernel(%arg0: i32, %arg1: memref<16x128xf32, #tpu.memory_space<vmem>>, %arg2: memref<4x16x16xf32, #tpu.memory_space<vmem>>, %arg3: memref<2x4x8x8xf32, #tpu.memory_space<vmem>>, %arg4: memref<64x448xf32, #tpu.memory_space<vmem>>, %arg5: memref<8x128xf32, #tpu.memory_space<vmem>>, %arg6: memref<16x64xf32, #tpu.memory_space<vmem>>) attributes {dimension_semantics = [#tpu.dimension_semantics<arbitrary>], iteration_bounds = array<i64: 1>, scalar_prefetch = 0 : i64, scratch_operands = 0 : i64, tpu.core_type = #tpu.core_type<tc>, window_params = [{pipeline_mode = #tpu.pipeline_mode<synchronous>, transform_indices = @transform_0, window_bounds = array<i64: 16, 128>}, {pipeline_mode = #tpu.pipeline_mode<synchronous>, transform_indices = @transform_1, window_bounds = array<i64: 4, 16, 16>}, {pipeline_mode = #tpu.pipeline_mode<synchronous>, transform_indices = @transform_2, window_bounds = array<i64: 2, 4, 8, 8>}, {pipeline_mode = #tpu.pipeline_mode<synchronous>, transform_indices = @transform_3, window_bounds = array<i64: 64, 448>}, {pipeline_mode = #tpu.pipeline_mode<synchronous>, transform_indices = @transform_4, window_bounds = array<i64: 8, 128>}, {pipeline_mode = #tpu.pipeline_mode<synchronous>, transform_indices = @transform_5, window_bounds = array<i64: 16, 64>}]} {
    %c0 = arith.constant 0 : index
    %c0_0 = arith.constant 0 : index
    %0 = vector.load %arg1[%c0, %c0_0] : memref<16x128xf32, #tpu.memory_space<vmem>>, vector<16x32xf32>
    %c0_1 = arith.constant 0 : index
    %c32 = arith.constant 32 : index
    %1 = vector.load %arg1[%c0_1, %c32] : memref<16x128xf32, #tpu.memory_space<vmem>>, vector<16x48xf32>
    %c0_2 = arith.constant 0 : index
    %c80 = arith.constant 80 : index
    %2 = vector.load %arg1[%c0_2, %c80] : memref<16x128xf32, #tpu.memory_space<vmem>>, vector<16x48xf32>
    %c0_3 = arith.constant 0 : index
    %c0_4 = arith.constant 0 : index
    %3 = vector.load %arg5[%c0_3, %c0_4] : memref<8x128xf32, #tpu.memory_space<vmem>>, vector<1x32xf32>
    %c1 = arith.constant 1 : index
    %c0_5 = arith.constant 0 : index
    %4 = vector.load %arg5[%c1, %c0_5] : memref<8x128xf32, #tpu.memory_space<vmem>>, vector<1x112xf32>
    %c2 = arith.constant 2 : index
    %c0_6 = arith.constant 0 : index
    %5 = vector.load %arg5[%c2, %c0_6] : memref<8x128xf32, #tpu.memory_space<vmem>>, vector<1x32xf32>
    %c3 = arith.constant 3 : index
    %c0_7 = arith.constant 0 : index
    %6 = vector.load %arg5[%c3, %c0_7] : memref<8x128xf32, #tpu.memory_space<vmem>>, vector<1x32xf32>
    %c4 = arith.constant 4 : index
    %c0_8 = arith.constant 0 : index
    %7 = vector.load %arg5[%c4, %c0_8] : memref<8x128xf32, #tpu.memory_space<vmem>>, vector<1x128xf32>
    %c5 = arith.constant 5 : index
    %c0_9 = arith.constant 0 : index
    %8 = vector.load %arg5[%c5, %c0_9] : memref<8x128xf32, #tpu.memory_space<vmem>>, vector<1x32xf32>
    %c0_10 = arith.constant 0 : index
    %c0_11 = arith.constant 0 : index
    %9 = vector.load %arg4[%c0_10, %c0_11] : memref<64x448xf32, #tpu.memory_space<vmem>>, vector<32x112xf32>
    %c0_12 = arith.constant 0 : index
    %c128 = arith.constant 128 : index
    %10 = vector.load %arg4[%c0_12, %c128] : memref<64x448xf32, #tpu.memory_space<vmem>>, vector<32x32xf32>
    %c0_13 = arith.constant 0 : index
    %c256 = arith.constant 256 : index
    %11 = vector.load %arg4[%c0_13, %c256] : memref<64x448xf32, #tpu.memory_space<vmem>>, vector<32x128xf32>
    %c0_14 = arith.constant 0 : index
    %c384 = arith.constant 384 : index
    %12 = vector.load %arg4[%c0_14, %c384] : memref<64x448xf32, #tpu.memory_space<vmem>>, vector<64x32xf32>
    %13 = arith.mulf %0, %0 : vector<16x32xf32>
    %cst = arith.constant dense<0.000000e+00> : vector<16xf32>
    %14 = vector.multi_reduction <add>, %13, %cst [1] : vector<16x32xf32> to vector<16xf32>
    %15 = vector.shape_cast %14 : vector<16xf32> to vector<16x1xf32>
    %cst_15 = arith.constant 3.200000e+01 : f32
    %16 = vector.broadcast %cst_15 : f32 to vector<16x1xf32>
    %17 = arith.divf %15, %16 : vector<16x1xf32>
    %cst_16 = arith.constant 9.99999997E-7 : f32
    %18 = vector.broadcast %cst_16 : f32 to vector<16x1xf32>
    %19 = arith.addf %17, %18 : vector<16x1xf32>
    %20 = math.rsqrt %19 : vector<16x1xf32>
    %21 = vector.broadcast %20 : vector<16x1xf32> to vector<16x32xf32>
    %22 = arith.mulf %0, %21 : vector<16x32xf32>
    %23 = vector.broadcast %3 : vector<1x32xf32> to vector<16x32xf32>
    %24 = arith.mulf %22, %23 : vector<16x32xf32>
    %cst_17 = arith.constant dense<0.000000e+00> : vector<16x112xf32>
    %25 = tpu.matmul %24, %9, %cst_17 {dimension_numbers = #tpu.dot_dimension_numbers<[1], [0], [0], [1], [0, 0, 1, 1], [], []>} : vector<16x32xf32>, vector<32x112xf32>, vector<16x112xf32> -> vector<16x112xf32>
    %26 = vector.broadcast %4 : vector<1x112xf32> to vector<16x112xf32>
    %27 = arith.addf %25, %26 : vector<16x112xf32>
    %28 = vector.extract_strided_slice %27 {offsets = [0, 0], sizes = [16, 48], strides = [1, 1]} : vector<16x112xf32> to vector<16x48xf32>
    %29 = arith.mulf %28, %1 : vector<16x48xf32>
    %30 = vector.extract_strided_slice %27 {offsets = [0, 64], sizes = [16, 48], strides = [1, 1]} : vector<16x112xf32> to vector<16x48xf32>
    %31 = arith.mulf %30, %2 : vector<16x48xf32>
    %32 = arith.addf %29, %31 : vector<16x48xf32>
    %33 = vector.extract_strided_slice %32 {offsets = [0, 0], sizes = [16, 32], strides = [1, 1]} : vector<16x48xf32> to vector<16x32xf32>
    %34 = vector.extract_strided_slice %32 {offsets = [0, 32], sizes = [16, 16], strides = [1, 1]} : vector<16x48xf32> to vector<16x16xf32>
    %35 = vector.extract_strided_slice %27 {offsets = [0, 48], sizes = [16, 16], strides = [1, 1]} : vector<16x112xf32> to vector<16x16xf32>
    %36 = vector.extract_strided_slice %33 {offsets = [0, 0], sizes = [8, 8], strides = [1, 1]} : vector<16x32xf32> to vector<8x8xf32>
    %37 = vector.extract_strided_slice %33 {offsets = [0, 8], sizes = [8, 8], strides = [1, 1]} : vector<16x32xf32> to vector<8x8xf32>
    %38 = tpu.concatenate %36, %37 in 0 : vector<8x8xf32>, vector<8x8xf32> -> vector<16x8xf32>
    %39 = vector.extract_strided_slice %33 {offsets = [0, 16], sizes = [8, 8], strides = [1, 1]} : vector<16x32xf32> to vector<8x8xf32>
    %40 = vector.extract_strided_slice %33 {offsets = [0, 24], sizes = [8, 8], strides = [1, 1]} : vector<16x32xf32> to vector<8x8xf32>
    %41 = tpu.concatenate %39, %40 in 0 : vector<8x8xf32>, vector<8x8xf32> -> vector<16x8xf32>
    %42 = vector.extract_strided_slice %33 {offsets = [8, 0], sizes = [8, 8], strides = [1, 1]} : vector<16x32xf32> to vector<8x8xf32>
    %43 = vector.extract_strided_slice %33 {offsets = [8, 8], sizes = [8, 8], strides = [1, 1]} : vector<16x32xf32> to vector<8x8xf32>
    %44 = tpu.concatenate %42, %43 in 0 : vector<8x8xf32>, vector<8x8xf32> -> vector<16x8xf32>
    %45 = vector.extract_strided_slice %33 {offsets = [8, 16], sizes = [8, 8], strides = [1, 1]} : vector<16x32xf32> to vector<8x8xf32>
    %46 = vector.extract_strided_slice %33 {offsets = [8, 24], sizes = [8, 8], strides = [1, 1]} : vector<16x32xf32> to vector<8x8xf32>
    %47 = tpu.concatenate %45, %46 in 0 : vector<8x8xf32>, vector<8x8xf32> -> vector<16x8xf32>
    %48 = vector.shape_cast %38 : vector<16x8xf32> to vector<1x16x8xf32>
    %49 = vector.shape_cast %41 : vector<16x8xf32> to vector<1x16x8xf32>
    %50 = vector.shape_cast %44 : vector<16x8xf32> to vector<1x16x8xf32>
    %51 = vector.shape_cast %47 : vector<16x8xf32> to vector<1x16x8xf32>
    %52 = tpu.concatenate %48, %49, %50, %51 in 0 : vector<1x16x8xf32>, vector<1x16x8xf32>, vector<1x16x8xf32>, vector<1x16x8xf32> -> vector<4x16x8xf32>
    %53 = vector.extract_strided_slice %34 {offsets = [0, 0], sizes = [8, 8], strides = [1, 1]} : vector<16x16xf32> to vector<8x8xf32>
    %54 = vector.extract_strided_slice %34 {offsets = [0, 8], sizes = [8, 8], strides = [1, 1]} : vector<16x16xf32> to vector<8x8xf32>
    %55 = vector.extract_strided_slice %34 {offsets = [8, 0], sizes = [8, 8], strides = [1, 1]} : vector<16x16xf32> to vector<8x8xf32>
    %56 = vector.extract_strided_slice %34 {offsets = [8, 8], sizes = [8, 8], strides = [1, 1]} : vector<16x16xf32> to vector<8x8xf32>
    %57 = vector.shape_cast %53 : vector<8x8xf32> to vector<1x8x8xf32>
    %58 = vector.shape_cast %54 : vector<8x8xf32> to vector<1x8x8xf32>
    %59 = vector.shape_cast %55 : vector<8x8xf32> to vector<1x8x8xf32>
    %60 = vector.shape_cast %56 : vector<8x8xf32> to vector<1x8x8xf32>
    %61 = tpu.concatenate %57, %58, %59, %60 in 0 : vector<1x8x8xf32>, vector<1x8x8xf32>, vector<1x8x8xf32>, vector<1x8x8xf32> -> vector<4x8x8xf32>
    %62 = vector.extract_strided_slice %35 {offsets = [0, 0], sizes = [8, 8], strides = [1, 1]} : vector<16x16xf32> to vector<8x8xf32>
    %63 = vector.extract_strided_slice %35 {offsets = [0, 8], sizes = [8, 8], strides = [1, 1]} : vector<16x16xf32> to vector<8x8xf32>
    %64 = vector.extract_strided_slice %35 {offsets = [8, 0], sizes = [8, 8], strides = [1, 1]} : vector<16x16xf32> to vector<8x8xf32>
    %65 = vector.extract_strided_slice %35 {offsets = [8, 8], sizes = [8, 8], strides = [1, 1]} : vector<16x16xf32> to vector<8x8xf32>
    %66 = vector.shape_cast %62 : vector<8x8xf32> to vector<1x8x8xf32>
    %67 = vector.shape_cast %63 : vector<8x8xf32> to vector<1x8x8xf32>
    %68 = vector.shape_cast %64 : vector<8x8xf32> to vector<1x8x8xf32>
    %69 = vector.shape_cast %65 : vector<8x8xf32> to vector<1x8x8xf32>
    %70 = tpu.concatenate %66, %67, %68, %69 in 0 : vector<1x8x8xf32>, vector<1x8x8xf32>, vector<1x8x8xf32>, vector<1x8x8xf32> -> vector<4x8x8xf32>
    %c0_18 = arith.constant 0 : index
    %c0_19 = arith.constant 0 : index
    %c0_20 = arith.constant 0 : index
    %c0_21 = arith.constant 0 : index
    %71 = vector.load %arg3[%c0_18, %c0_19, %c0_20, %c0_21] : memref<2x4x8x8xf32, #tpu.memory_space<vmem>>, vector<1x4x8x8xf32>
    %72 = vector.shape_cast %71 : vector<1x4x8x8xf32> to vector<4x8x8xf32>
    %73 = tpu.concatenate %72, %61 in 1 : vector<4x8x8xf32>, vector<4x8x8xf32> -> vector<4x16x8xf32>
    %c1_22 = arith.constant 1 : index
    %c0_23 = arith.constant 0 : index
    %c0_24 = arith.constant 0 : index
    %c0_25 = arith.constant 0 : index
    %74 = vector.load %arg3[%c1_22, %c0_23, %c0_24, %c0_25] : memref<2x4x8x8xf32, #tpu.memory_space<vmem>>, vector<1x4x8x8xf32>
    %75 = vector.shape_cast %74 : vector<1x4x8x8xf32> to vector<4x8x8xf32>
    %76 = tpu.concatenate %75, %70 in 1 : vector<4x8x8xf32>, vector<4x8x8xf32> -> vector<4x16x8xf32>
    "tpu.trace_start"() <{level = 10 : i32, message = "zqd,zkd->zqk"}> : () -> ()
    %cst_26 = arith.constant dense<0.000000e+00> : vector<4x16x16xf32>
    %77 = tpu.matmul %52, %73, %cst_26 {dimension_numbers = #tpu.dot_dimension_numbers<[2], [2], [1], [1], [0, 0, 0, 1, 1, 1], [0], [0]>} : vector<4x16x8xf32>, vector<4x16x8xf32>, vector<4x16x16xf32> -> vector<4x16x16xf32>
    "tpu.trace_stop"() : () -> ()
    %c0_27 = arith.constant 0 : index
    %c0_28 = arith.constant 0 : index
    %c0_29 = arith.constant 0 : index
    %78 = vector.load %arg2[%c0_27, %c0_28, %c0_29] : memref<4x16x16xf32, #tpu.memory_space<vmem>>, vector<4x16x16xf32>
    %79 = arith.addf %77, %78 : vector<4x16x16xf32>
    %cst_30 = arith.constant dense<0xFF800000> : vector<4x16xf32>
    %80 = vector.multi_reduction <maximumf>, %79, %cst_30 [2] : vector<4x16x16xf32> to vector<4x16xf32>
    %81 = vector.shape_cast %80 : vector<4x16xf32> to vector<4x16x1xf32>
    %82 = vector.broadcast %81 : vector<4x16x1xf32> to vector<4x16x16xf32>
    %83 = arith.subf %79, %82 : vector<4x16x16xf32>
    %84 = math.exp %83 : vector<4x16x16xf32>
    %cst_31 = arith.constant dense<0.000000e+00> : vector<4x16xf32>
    %85 = vector.multi_reduction <add>, %84, %cst_31 [2] : vector<4x16x16xf32> to vector<4x16xf32>
    %86 = vector.shape_cast %85 : vector<4x16xf32> to vector<4x16x1xf32>
    %87 = tpu.reciprocal %86 {approx = true} : vector<4x16x1xf32> -> vector<4x16x1xf32>
    %88 = vector.broadcast %87 : vector<4x16x1xf32> to vector<4x16x16xf32>
    %89 = arith.mulf %84, %88 : vector<4x16x16xf32>
    "tpu.trace_start"() <{level = 10 : i32, message = "zqk,zkd->zqd"}> : () -> ()
    %cst_32 = arith.constant dense<0.000000e+00> : vector<4x16x8xf32>
    %90 = tpu.matmul %89, %76, %cst_32 {dimension_numbers = #tpu.dot_dimension_numbers<[2], [1], [1], [2], [0, 0, 0, 1, 1, 2], [0], [0]>} : vector<4x16x16xf32>, vector<4x16x8xf32>, vector<4x16x8xf32> -> vector<4x16x8xf32>
    "tpu.trace_stop"() : () -> ()
    %91 = vector.extract_strided_slice %90 {offsets = [0, 0, 0], sizes = [1, 8, 8], strides = [1, 1, 1]} : vector<4x16x8xf32> to vector<1x8x8xf32>
    %92 = vector.shape_cast %91 : vector<1x8x8xf32> to vector<8x8xf32>
    %93 = vector.extract_strided_slice %90 {offsets = [0, 8, 0], sizes = [1, 8, 8], strides = [1, 1, 1]} : vector<4x16x8xf32> to vector<1x8x8xf32>
    %94 = vector.shape_cast %93 : vector<1x8x8xf32> to vector<8x8xf32>
    %95 = vector.extract_strided_slice %90 {offsets = [1, 0, 0], sizes = [1, 8, 8], strides = [1, 1, 1]} : vector<4x16x8xf32> to vector<1x8x8xf32>
    %96 = vector.shape_cast %95 : vector<1x8x8xf32> to vector<8x8xf32>
    %97 = vector.extract_strided_slice %90 {offsets = [1, 8, 0], sizes = [1, 8, 8], strides = [1, 1, 1]} : vector<4x16x8xf32> to vector<1x8x8xf32>
    %98 = vector.shape_cast %97 : vector<1x8x8xf32> to vector<8x8xf32>
    %99 = tpu.concatenate %92, %94, %96, %98 in 1 : vector<8x8xf32>, vector<8x8xf32>, vector<8x8xf32>, vector<8x8xf32> -> vector<8x32xf32>
    %100 = vector.extract_strided_slice %90 {offsets = [2, 0, 0], sizes = [1, 8, 8], strides = [1, 1, 1]} : vector<4x16x8xf32> to vector<1x8x8xf32>
    %101 = vector.shape_cast %100 : vector<1x8x8xf32> to vector<8x8xf32>
    %102 = vector.extract_strided_slice %90 {offsets = [2, 8, 0], sizes = [1, 8, 8], strides = [1, 1, 1]} : vector<4x16x8xf32> to vector<1x8x8xf32>
    %103 = vector.shape_cast %102 : vector<1x8x8xf32> to vector<8x8xf32>
    %104 = vector.extract_strided_slice %90 {offsets = [3, 0, 0], sizes = [1, 8, 8], strides = [1, 1, 1]} : vector<4x16x8xf32> to vector<1x8x8xf32>
    %105 = vector.shape_cast %104 : vector<1x8x8xf32> to vector<8x8xf32>
    %106 = vector.extract_strided_slice %90 {offsets = [3, 8, 0], sizes = [1, 8, 8], strides = [1, 1, 1]} : vector<4x16x8xf32> to vector<1x8x8xf32>
    %107 = vector.shape_cast %106 : vector<1x8x8xf32> to vector<8x8xf32>
    %108 = tpu.concatenate %101, %103, %105, %107 in 1 : vector<8x8xf32>, vector<8x8xf32>, vector<8x8xf32>, vector<8x8xf32> -> vector<8x32xf32>
    %109 = tpu.concatenate %99, %108 in 0 : vector<8x32xf32>, vector<8x32xf32> -> vector<16x32xf32>
    %cst_33 = arith.constant dense<0.000000e+00> : vector<16x32xf32>
    %110 = tpu.matmul %109, %10, %cst_33 {dimension_numbers = #tpu.dot_dimension_numbers<[1], [0], [0], [1], [0, 0, 1, 1], [], []>} : vector<16x32xf32>, vector<32x32xf32>, vector<16x32xf32> -> vector<16x32xf32>
    %111 = vector.broadcast %5 : vector<1x32xf32> to vector<16x32xf32>
    %112 = arith.addf %110, %111 : vector<16x32xf32>
    %113 = arith.addf %0, %112 : vector<16x32xf32>
    %114 = arith.mulf %113, %113 : vector<16x32xf32>
    %cst_34 = arith.constant dense<0.000000e+00> : vector<16xf32>
    %115 = vector.multi_reduction <add>, %114, %cst_34 [1] : vector<16x32xf32> to vector<16xf32>
    %116 = vector.shape_cast %115 : vector<16xf32> to vector<16x1xf32>
    %cst_35 = arith.constant 3.200000e+01 : f32
    %117 = vector.broadcast %cst_35 : f32 to vector<16x1xf32>
    %118 = arith.divf %116, %117 : vector<16x1xf32>
    %cst_36 = arith.constant 9.99999997E-7 : f32
    %119 = vector.broadcast %cst_36 : f32 to vector<16x1xf32>
    %120 = arith.addf %118, %119 : vector<16x1xf32>
    %121 = math.rsqrt %120 : vector<16x1xf32>
    %122 = vector.broadcast %121 : vector<16x1xf32> to vector<16x32xf32>
    %123 = arith.mulf %113, %122 : vector<16x32xf32>
    %124 = vector.broadcast %6 : vector<1x32xf32> to vector<16x32xf32>
    %125 = arith.mulf %123, %124 : vector<16x32xf32>
    %cst_37 = arith.constant dense<0.000000e+00> : vector<16x128xf32>
    %126 = tpu.matmul %125, %11, %cst_37 {dimension_numbers = #tpu.dot_dimension_numbers<[1], [0], [0], [1], [0, 0, 1, 1], [], []>} : vector<16x32xf32>, vector<32x128xf32>, vector<16x128xf32> -> vector<16x128xf32>
    %127 = vector.broadcast %7 : vector<1x128xf32> to vector<16x128xf32>
    %128 = arith.addf %126, %127 : vector<16x128xf32>
    %129 = vector.extract_strided_slice %128 {offsets = [0, 0], sizes = [16, 64], strides = [1, 1]} : vector<16x128xf32> to vector<16x64xf32>
    %130 = vector.extract_strided_slice %128 {offsets = [0, 64], sizes = [16, 64], strides = [1, 1]} : vector<16x128xf32> to vector<16x64xf32>
    %cst_38 = arith.constant 0.000000e+00 : f32
    %131 = vector.broadcast %cst_38 : f32 to vector<16x64xf32>
    %132 = arith.subf %131, %129 : vector<16x64xf32>
    %133 = math.exp %132 : vector<16x64xf32>
    %cst_39 = arith.constant 1.000000e+00 : f32
    %134 = vector.broadcast %cst_39 : f32 to vector<16x64xf32>
    %135 = arith.addf %134, %133 : vector<16x64xf32>
    %136 = tpu.reciprocal %135 {approx = true} : vector<16x64xf32> -> vector<16x64xf32>
    %137 = arith.mulf %129, %136 : vector<16x64xf32>
    %138 = arith.mulf %137, %130 : vector<16x64xf32>
    %cst_40 = arith.constant dense<0.000000e+00> : vector<16x32xf32>
    %139 = tpu.matmul %138, %12, %cst_40 {dimension_numbers = #tpu.dot_dimension_numbers<[1], [0], [0], [1], [0, 0, 1, 1], [], []>} : vector<16x64xf32>, vector<64x32xf32>, vector<16x32xf32> -> vector<16x32xf32>
    %140 = vector.broadcast %8 : vector<1x32xf32> to vector<16x32xf32>
    %141 = arith.addf %139, %140 : vector<16x32xf32>
    %142 = arith.addf %113, %141 : vector<16x32xf32>
    %143 = tpu.concatenate %142, %34, %35 in 1 : vector<16x32xf32>, vector<16x16xf32>, vector<16x16xf32> -> vector<16x64xf32>
    %c0_41 = arith.constant 0 : index
    %c0_42 = arith.constant 0 : index
    %144 = vector.load %arg6[%c0_41, %c0_42] : memref<16x64xf32, #tpu.memory_space<vmem>>, vector<16x64xf32>
    tpu.vector_store %arg6[%c0_41, %c0_42], %143 {strides = array<i32>} : memref<16x64xf32, #tpu.memory_space<vmem>>, vector<16x64xf32>,
    return
  }
  func.func @transform_0(%arg0: i32) -> (i32, i32) {
    %c0_i32 = arith.constant 0 : i32
    %c0_i32_0 = arith.constant 0 : i32
    %c0_i32_1 = arith.constant 0 : i32
    return %c0_i32, %c0_i32_0 : i32, i32
  }
  func.func @transform_1(%arg0: i32) -> (i32, i32, i32) {
    %c0_i32 = arith.constant 0 : i32
    %c0_i32_0 = arith.constant 0 : i32
    %c0_i32_1 = arith.constant 0 : i32
    %c0_i32_2 = arith.constant 0 : i32
    return %c0_i32, %c0_i32_0, %c0_i32_1 : i32, i32, i32
  }
  func.func @transform_2(%arg0: i32) -> (i32, i32, i32, i32) {
    %c0_i32 = arith.constant 0 : i32
    %c0_i32_0 = arith.constant 0 : i32
    %c0_i32_1 = arith.constant 0 : i32
    %c0_i32_2 = arith.constant 0 : i32
    %c0_i32_3 = arith.constant 0 : i32
    return %c0_i32, %c0_i32_0, %c0_i32_1, %c0_i32_2 : i32, i32, i32, i32
  }
  func.func @transform_3(%arg0: i32) -> (i32, i32) {
    %c0_i32 = arith.constant 0 : i32
    %c0_i32_0 = arith.constant 0 : i32
    %c0_i32_1 = arith.constant 0 : i32
    return %c0_i32, %c0_i32_0 : i32, i32
  }
  func.func @transform_4(%arg0: i32) -> (i32, i32) {
    %c0_i32 = arith.constant 0 : i32
    %c0_i32_0 = arith.constant 0 : i32
    %c0_i32_1 = arith.constant 0 : i32
    return %c0_i32, %c0_i32_0 : i32, i32
  }
  func.func @transform_5(%arg0: i32) -> (i32, i32) {
    %c0_i32 = arith.constant 0 : i32
    %c0_i32_0 = arith.constant 0 : i32
    %c0_i32_1 = arith.constant 0 : i32
    return %c0_i32, %c0_i32_0 : i32, i32
  }
}

</mosaic_0001>

<bundles_post_ra>
// kernel: decoder_layer_forward.1
= control target key start
LH: loop header
LB: loop body
LE: loop exit
PB: predicated region body
PF: predicated region fallthrough
CT: control target
= control target key end

     0   :  { %vm50_vm0 = vcmask 261120   ;;  %s1699_s29 = smov 112   ;;  %s1700_s30 = smov 96   ;;  %vm242_vm1 = vcmask 64512   ;;  %vm579_vm3 = vcmask 130048   ;;  %vm1006_vm4 = vcmask 195584   ;;  %s2047_s0 = inlined_call_operand.vmem [shape: f32[16,128], index: 0, kind: input, shape index: {}]   ;;  %s2048_s3 = inlined_call_operand.vmem [shape: f32[64,448], index: 3, kind: input, shape index: {}]   ;;  %s2049_s4 = inlined_call_operand.vmem [shape: f32[8,128], index: 4, kind: input, shape index: {}]   ;;  %s2050_s2 = inlined_call_operand.vmem [shape: f32[2,4,8,8], index: 2, kind: input, shape index: {}]   ;;  %s2051_s1 = inlined_call_operand.vmem [shape: f32[4,16,16], index: 1, kind: input, shape index: {}]   ;;  %s2052_s5 = inlined_call_operand.vmem [shape: f32[16,64], index: 5, kind: output, shape index: {}]  }
   0x1   :  { %v1740_v0 = vld [vmem:[%s2047_s0] sm:$0xff]  ;;  %v1745_v1 = vld [vmem:[%s2047_s0 + $0x8] sm:$0xff]  ;;  %s1701_s10 = smov 64   ;;  %s1702_s11 = smov 120   ;;  %vm1821_vm2 = vmpackc.low %vm242_vm1, %vm242_vm1  ;;  %vm1243_vm5 = vcmask 523264   ;;  %vm1329_vm6 = vcmask 392192  }
   0x2   :  { %v48_v2 = vmul.f32 %v1740_v0, %v1740_v0  ;;  %v49_v3 = vmul.f32 %v1745_v1, %v1745_v1  ;;  %v28_v6 = vld [vmem:[%s2048_s3] sm:$0xff]  ;;  %167 = vrot.lane.b32.xlu1 %v1740_v0, %s1699_s29  ;;  %v206_v48 = vld [vmem:[%s2050_s2 + $0x8] sm:$0xff]  ;;  %v207_v55 = vld [vmem:[%s2050_s2 + $0x10] sm:$0xff]  ;;  %s1704_s22 = smov 8   ;;  %s1705_s23 = smov 24  }
   0x3   :  { %v29_v7 = vld [vmem:[%s2048_s3 + $0x20] sm:$0xff]  ;;  %v208_v56 = vld [vmem:[%s2050_s2 + $0x18] sm:$0xff]  ;;  %s1706_s24 = smov 16  }
   0x4   :  { %v51_v4 = vsel %vm50_vm0, %v48_v2, 0.0  ;;  %v54_v5 = vsel %vm50_vm0, %v49_v3, 0.0  ;;  %v30_v8 = vld [vmem:[%s2048_s3 + $0x40] sm:$0xff]  ;;  %v1548_v9 = vpack.c.bf16 %v29_v7, %v28_v6  ;;  %v235_v3 = vld [vmem:[%s2051_s1 + $0x8] sm:$0xff]  ;;  %v236_v6 = vld [vmem:[%s2051_s1 + $0x10] sm:$0xff] }
   0x5   :  { %52 = vadd.xlane.f32.xlu0 %v51_v4  ;;  %v31_v10 = vld [vmem:[%s2048_s3 + $0x60] sm:$0xff] }
   0x6   :  { %v1552_v11 = vpack.c.bf16 %v31_v10, %v30_v8  ;;  %1549 = vmatprep.subr.bf16.mxu1 %v1548_v9  ;;  %169 = vrot.lane.b32.xlu1 %v1745_v1, %s1699_s29  ;;  %v1338_v19 = vld [vmem:[%s2049_s4] ss:$0 sm:$0xff]  ;;  %v1339_v25 = vld [vmem:[%s2049_s4 + $0x1] ss:$0 sm:$0xff]  ;;  %v237_v8 = vld [vmem:[%s2051_s1 + $0x18] sm:$0xff] }
   0x7   :  { %1551 = vmatpush3.bf16.msra.mxu1 %v1548_v9  ;;  %v205_v46 = vld [vmem:[%s2050_s2] sm:$0xff] }
   0x8   :  { %1553 = vmatprep.subr.bf16.mxu1 %v1552_v11  ;;  %v234_v4 = vld [vmem:[%s2051_s1] sm:$0xff] }
   0x9   :  { %55 = vadd.xlane.f32.xlu0 %v54_v5 }
   0xb   :  { %1555 = vmatpush3.bf16.msra.mxu1 %v1552_v11 }
  0x1f   :  { %159 = vrot.lane.b32.xlu0 %v1740_v0, %s1700_s30 }
  0x74   :  { %v168_v29 = vpop.permute.xlu1 %167 }
  0x78   :  { %v170_v32 = vpop.permute.xlu1 %169 }
  0x92   :  { %v53_v12 = vpop.xlane.xlu0 %52 }
  0x93   :  { %v58_v13 = vmul.f32 0.03125, %v53_v12 }
  0x95   :  { %v60_v14 = vadd.f32 1e-06, %v58_v13 }
  0x96   :  { %v56_v15 = vpop.xlane.xlu0 %55 }
  0x97   :  { %1651 = vrsqrt.f32 %v60_v14  ;;  %v59_v16 = vmul.f32 0.03125, %v56_v15 }
  0x99   :  { %v61_v17 = vadd.f32 1e-06, %v59_v16 }
  0x9a   :  { %v160_v34 = vpop.permute.xlu0 %159 }
  0x9b   :  { %1653 = vrsqrt.f32 %v61_v17 }
  0xa1   :  { %v1652_v18 = vpop.eup %1651 }
  0xa2   :  { %v64_v20 = vmul.f32 %v1652_v18, %v1740_v0  ;;  %v241_v18 = vld [vmem:[%s2051_s1 + $0x38] sm:$0xff] }
  0xa4   :  { %v70_v21 = vmul.f32 %v1338_v19, %v64_v20 }
  0xa5   :  { %v1654_v22 = vpop.eup %1653 }
  0xa6   :  { %v65_v23 = vmul.f32 %v1654_v22, %v1745_v1  ;;  %1448 = vmatprep.mubr.msk.f32.mxu1 %vm50_vm0, %v70_v21 }
  0xa8   :  { %v71_v24 = vmul.f32 %v1338_v19, %v65_v23  ;;  %v238_v19 = vld [vmem:[%s2051_s1 + $0x20] sm:$0xff]  ;;  %v239_v23 = vld [vmem:[%s2051_s1 + $0x28] sm:$0xff] }
  0xaa   :  { %1449 = vmatmul.mubr.msk.f32.vlgmr.msra.gmra.mrb[0].mxu1 %vm50_vm0, %v71_v24 }
 0x17d   :  { %v1450_v26 = vpop.f32.mrb[0].mxu1 }
 0x17e   :  { %v148_v27 = vpop.f32.mrb[1].mxu1  ;;  %v1785_v31 = vadd.f32 %v1450_v26, %v1339_v25 }
 0x17f   :  { %v1781_v28 = vadd.f32 %v1339_v25, %v148_v27  ;;  %v240_v25 = vld [vmem:[%s2051_s1 + $0x30] sm:$0xff]  ;;  %s1703_s1 = smov 80  }
 0x180   :  { %v174_v33 = vmul.f32 %v170_v32, %v1785_v31 }
 0x181   :  { %v173_v30 = vmul.f32 %v168_v29, %v1781_v28  ;;  %v165_v35 = vmul.f32 %v160_v34, %v1781_v28 }
 0x183   :  { %177 = vrot.lane.b32.xlu1 %v173_v30, %s1701_s10 }
 0x187   :  { %161 = vrot.lane.b32.xlu1 %v1745_v1, %s1700_s30 }
 0x18b   :  { %179 = vrot.lane.b32.xlu1 %v174_v33, %s1701_s10 }
 0x1f5   :  { %v178_v36 = vpop.permute.xlu1 %177 }
 0x1f6   :  { %v1792_v37 = vadd.f32 %v178_v36, %v165_v35 }
 0x1f8   :  { %186 = vrot.lane.b32.xlu1 %v1792_v37, %s1702_s11  ;;  %1455 = vmatprep.mubr.msk.f32.mxu1 %vm242_vm1, %v1792_v37 }
 0x1f9   :  { %v162_v38 = vpop.permute.xlu1 %161 }
 0x1fa   :  { %v166_v39 = vmul.f32 %v162_v38, %v1785_v31 }
 0x1fd   :  { %v180_v40 = vpop.permute.xlu1 %179 }
 0x1fe   :  { %v1799_v41 = vadd.f32 %v180_v40, %v166_v39 }
 0x200   :  { %189 = vrot.lane.b32.xlu1 %v1799_v41, %s1702_s11 }
 0x26a   :  { %v187_v42 = vpop.permute.xlu1 %186 }
 0x26b   :  { %v1636_v43 = vpack.i.bf16 %v187_v42, %v1792_v37 }
 0x26d   :  { %1637 = vrot.lane.b32.xlu1 %v1636_v43, %s1700_s30 }
 0x271   :  { %191 = vrot.lane.b32.xlu1 %v1792_v37, %s1699_s29 }
 0x272   :  { %v190_v44 = vpop.permute.xlu1 %189 }
 0x273   :  { %v1641_v45 = vpack.i.bf16 %v190_v44, %v1799_v41 }
 0x275   :  { %195 = vrot.lane.b32.xlu1 %v1799_v41, %s1699_s29  ;;  %1642 = vrot.lane.b32.xlu0 %v1641_v45, %s1700_s30 }
 0x279   :  { %193 = vrot.lane.b32.xlu0 %v187_v42, %s1699_s29 }
 0x27d   :  { %197 = vrot.lane.b32.xlu0 %v190_v44, %s1699_s29 }
 0x2df   :  { %v1638_v47 = vpop.permute.xlu1 %1637 }
 0x2e0   :  { %v1640_v49 = vunpack.i.h.bf16 %v1638_v47  ;;  %v1639_v50 = vunpack.i.l.bf16 %v1638_v47 }
 0x2e2   :  { %v1556_v52 = vpack.c.bf16 %v1639_v50, %v205_v46  ;;  %v1562_v53 = vpack.c.bf16 %v1640_v49, %v206_v48 }
 0x2e3   :  { %v192_v54 = vpop.permute.xlu1 %191 }
 0x2e4   :  { %1558 = vmatprep.subr.msk.bf16.mxu1 %vm1821_vm2, %v1556_v52  ;;  %1564 = vmatprep.subr.msk.bf16.mxu0 %vm1821_vm2, %v1562_v53 }
 0x2e5   :  { %1462 = vmatprep.mubr.msk.f32.mxu0 %vm242_vm1, %v192_v54  ;;  %1561 = vmatpush3.bf16.xpose.msk.msra.mxu1 %vm1821_vm2, %v1556_v52 }
 0x2e6   :  { %1567 = vmatpush3.bf16.xpose.msk.msra.mxu0 %vm1821_vm2, %v1562_v53 }
 0x2e7   :  { %v1643_v57 = vpop.permute.xlu0 %1642  ;;  %v196_v63 = vpop.permute.xlu1 %195 }
 0x2e8   :  { %v1645_v58 = vunpack.i.h.bf16 %v1643_v57  ;;  %v1644_v59 = vunpack.i.l.bf16 %v1643_v57 }
 0x2ea   :  { %v1574_v60 = vpack.c.bf16 %v1645_v58, %v208_v56  ;;  %v1568_v61 = vpack.c.bf16 %v1644_v59, %v207_v55 }
 0x2eb   :  { %v194_v62 = vpop.permute.xlu0 %193 }
 0x2ec   :  { %1456 = vmatmul.mubr.msk.f32.vlgmr.msra.gmra.mrb[2].mxu1 %vm242_vm1, %v187_v42  ;;  %1570 = vmatprep.subr.msk.bf16.mxu1 %vm1821_vm2, %v1568_v61 }
 0x2ed   :  { %1463 = vmatmul.mubr.msk.f32.vlgmr.msra.gmra.mrb[0].mxu0 %vm242_vm1, %v194_v62  ;;  %1576 = vmatprep.subr.msk.bf16.mxu0 %vm1821_vm2, %v1574_v60 }
 0x2ee   :  { %1573 = vmatpush3.bf16.xpose.msk.msra.mxu1 %vm1821_vm2, %v1568_v61  ;;  %1469 = vmatprep.mubr.msk.f32.mxu1 %vm242_vm1, %v1799_v41 }
 0x2ef   :  { %1579 = vmatpush3.bf16.xpose.msk.msra.mxu0 %vm1821_vm2, %v1574_v60  ;;  %1476 = vmatprep.mubr.msk.f32.mxu0 %vm242_vm1, %v196_v63  ;;  %v198_v2 = vpop.permute.xlu0 %197 }
 0x2f5   :  { %1470 = vmatmul.mubr.msk.f32.vlgmr.msra.gmra.mrb[4].mxu1 %vm242_vm1, %v190_v44 }
 0x2f6   :  { %1477 = vmatmul.mubr.msk.f32.vlgmr.msra.gmra.mrb[2].mxu0 %vm242_vm1, %v198_v2 }
 0x3bf   :  { %v1457_v5 = vpop.f32.mrb[2].mxu1 }
 0x3c0   :  { %v324_v7 = vadd.f32 %v1457_v5, %v235_v3  ;;  %v1464_v9 = vpop.f32.mrb[0].mxu0  ;;  %v318_v10 = vpop.f32.mrb[3].mxu1 }
 0x3c1   :  { %v319_v11 = vadd.f32 %v318_v10, %v234_v4  ;;  %v402_v12 = vpop.f32.mrb[1].mxu0  ;;  %v408_v15 = vadd.f32 %v1464_v9, %v237_v8 }
 0x3c2   :  { %v403_v13 = vadd.f32 %v402_v12, %v236_v6  ;;  %v583_v14 = vsel %vm579_vm3, %v324_v7, -inf }
 0x3c3   :  { %584 = vmax.xlane.f32.xlu0 %v583_v14  ;;  %v580_v16 = vsel %vm579_vm3, %v319_v11, -inf  ;;  %v589_v20 = vsel %vm579_vm3, %v408_v15, -inf }
 0x3c4   :  { %581 = vmax.xlane.f32.xlu1 %v580_v16  ;;  %v586_v17 = vsel %vm579_vm3, %v403_v13, -inf }
 0x3c7   :  { %587 = vmax.xlane.f32.xlu0 %v586_v17 }
 0x3c8   :  { %v1471_v21 = vpop.f32.mrb[4].mxu1  ;;  %590 = vmax.xlane.f32.xlu1 %v589_v20 }
 0x3c9   :  { %v1478_v22 = vpop.f32.mrb[2].mxu0  ;;  %v486_v24 = vpop.f32.mrb[5].mxu1  ;;  %v492_v30 = vadd.f32 %v1471_v21, %v239_v23 }
 0x3ca   :  { %v1883_v26 = vadd.f32 %v1478_v22, %v241_v18  ;;  %v487_v27 = vadd.f32 %v486_v24, %v238_v19  ;;  %v570_v29 = vpop.f32.mrb[3].mxu0 }
 0x3cb   :  { %v571_v32 = vadd.f32 %v570_v29, %v240_v25  ;;  %v595_v35 = vsel %vm579_vm3, %v492_v30, -inf  ;;  %v1342_v29 = vld [vmem:[%s2050_s2 + $0x20] sm:$0xff] }
 0x3cc   :  { %v592_v33 = vsel %vm579_vm3, %v487_v27, -inf  ;;  %v601_v34 = vsel %vm579_vm3, %v1883_v26, -inf }
 0x3cd   :  { %593 = vmax.xlane.f32.xlu0 %v592_v33  ;;  %602 = vmax.xlane.f32.xlu1 %v601_v34  ;;  %v598_v36 = vsel %vm579_vm3, %v571_v32, -inf }
 0x3d1   :  { %596 = vmax.xlane.f32.xlu0 %v595_v35  ;;  %599 = vmax.xlane.f32.xlu1 %v598_v36 }
 0x3e2   :  { %203 = vrot.lane.b32.xlu1 %v1785_v31, %s1702_s11 }
 0x3e7   :  { %200 = vrot.lane.b32.xlu0 %v1781_v28, %s1702_s11 }
 0x450   :  { %v585_v38 = vpop.xlane.xlu0 %584 }
 0x451   :  { %v605_v39 = vsub.f32 %v324_v7, %v585_v38  ;;  %v582_v40 = vpop.xlane.xlu1 %581 }
 0x452   :  { %v604_v42 = vsub.f32 %v319_v11, %v582_v40 }
 0x453   :  { %v614_v43 = vmul.f32 1.442695, %v605_v39 }
 0x454   :  { %v612_v44 = vmul.f32 1.442695, %v604_v42  ;;  %v588_v45 = vpop.xlane.xlu0 %587 }
 0x455   :  { %1655 = vpow2.f32 %v614_v43  ;;  %v591_v46 = vpop.xlane.xlu1 %590  ;;  %v606_v56 = vsub.f32 %v403_v13, %v588_v45 }
 0x456   :  { %1657 = vpow2.f32 %v612_v44  ;;  %v607_v47 = vsub.f32 %v408_v15, %v591_v46 }
 0x457   :  { %v616_v61 = vmul.f32 1.442695, %v606_v56 }
 0x458   :  { %v618_v48 = vmul.f32 1.442695, %v607_v47 }
 0x45a   :  { %1659 = vpow2.f32 %v618_v48  ;;  %v594_v49 = vpop.xlane.xlu0 %593  ;;  %v603_v8 = vpop.xlane.xlu1 %602  ;;  %v1344_v48 = vld [vmem:[%s2050_s2 + $0x30] sm:$0xff] }
 0x45b   :  { %v608_v50 = vsub.f32 %v487_v27, %v594_v49  ;;  %v611_v9 = vsub.f32 %v1883_v26, %v603_v8  ;;  %v1345_v49 = vld [vmem:[%s2050_s2 + $0x38] sm:$0xff] }
 0x45d   :  { %v620_v57 = vmul.f32 1.442695, %v608_v50  ;;  %v626_v11 = vmul.f32 1.442695, %v611_v9 }
 0x45e   :  { %v597_v51 = vpop.xlane.xlu0 %596  ;;  %v600_v10 = vpop.xlane.xlu1 %599 }
 0x45f   :  { %v1894_v52 = vpop.eup %1655  ;;  %v609_v53 = vsub.f32 %v492_v30, %v597_v51  ;;  %v610_v12 = vsub.f32 %v571_v32, %v600_v10  ;;  %v1343_v30 = vld [vmem:[%s2050_s2 + $0x28] sm:$0xff] }
 0x460   :  { %v1658_v54 = vpop.eup %1657  ;;  %v631_v55 = vsel %vm579_vm3, %v1894_v52, 0.0 }
 0x461   :  { %v622_v58 = vmul.f32 1.442695, %v609_v53  ;;  %632 = vadd.xlane.f32.xlu0 %v631_v55  ;;  %v628_v59 = vsel %vm579_vm3, %v1658_v54, 0.0  ;;  %v624_v13 = vmul.f32 1.442695, %v610_v12 }
 0x462   :  { %629 = vadd.xlane.f32.xlu1 %v628_v59  ;;  %v201_v6 = vpop.permute.xlu0 %200  ;;  %v204_v18 = vpop.permute.xlu1 %203 }
 0x463   :  { %1661 = vpow2.f32 %v622_v58  ;;  %v1646_v19 = vpack.i.bf16 %v204_v18, %v1785_v31 }
 0x464   :  { %v1899_v60 = vpop.eup %1659  ;;  %1663 = vpow2.f32 %v620_v57 }
 0x465   :  { %v637_v62 = vsel %vm579_vm3, %v1899_v60, 0.0  ;;  %1665 = vpow2.f32 %v616_v61  ;;  %v32_v61 = vld [vmem:[%s2048_s3 + $0x8] sm:$0xff] }
 0x466   :  { %638 = vadd.xlane.f32.xlu1 %v637_v62  ;;  %1667 = vpow2.f32 %v626_v11  ;;  %v33_v62 = vld [vmem:[%s2048_s3 + $0x28] sm:$0xff] }
 0x467   :  { %1669 = vpow2.f32 %v624_v13 }
 0x46d   :  { %v1903_v63 = vpop.eup %1661 }
 0x46e   :  { %v643_v2 = vsel %vm579_vm3, %v1903_v63, 0.0  ;;  %v1664_v3 = vpop.eup %1663 }
 0x46f   :  { %644 = vadd.xlane.f32.xlu0 %v643_v2  ;;  %v640_v4 = vsel %vm579_vm3, %v1664_v3, 0.0  ;;  %v1666_v5 = vpop.eup %1665  ;;  %v1596_v2 = vpack.c.bf16 %v33_v62, %v32_v61  ;;  %v43_v61 = vld [vmem:[%s2048_s3 + $0x78] sm:$0xff] }
 0x470   :  { %v634_v7 = vsel %vm579_vm3, %v1666_v5, 0.0  ;;  %v1911_v14 = vpop.eup %1667 }
 0x471   :  { %v649_v15 = vsel %vm579_vm3, %v1911_v14, 0.0  ;;  %v1915_v16 = vpop.eup %1669 }
 0x472   :  { %v646_v17 = vsel %vm579_vm3, %v1915_v16, 0.0 }
 0x473   :  { %641 = vadd.xlane.f32.xlu0 %v640_v4 }
 0x477   :  { %635 = vadd.xlane.f32.xlu0 %v634_v7  ;;  %224 = vrot.lane.b32.xlu1 %v201_v6, %s1703_s1  ;;  %v34_v6 = vld [vmem:[%s2048_s3 + $0x48] sm:$0xff] }
 0x478   :  { %v35_v7 = vld [vmem:[%s2048_s3 + $0x68] sm:$0xff] }
 0x479   :  { %v1600_v8 = vpack.c.bf16 %v35_v7, %v34_v6  ;;  %v1374_v7 = vld [vmem:[%s2049_s4 + $0x4] ss:$0 sm:$0xff] }
 0x48d   :  { %222 = vrot.lane.b32.xlu0 %v1781_v28, %s1703_s1 }
 0x49b   :  { %650 = vadd.xlane.f32.xlu1 %v649_v15 }
 0x49f   :  { %647 = vadd.xlane.f32.xlu1 %v646_v17 }
 0x4b0   :  { %1647 = vrot.lane.b32.xlu1 %v1646_v19, %s1703_s1 }
 0x4ee   :  { %v633_v21 = vpop.xlane.xlu0 %632 }
 0x4ef   :  { %v630_v20 = vpop.xlane.xlu1 %629 }
 0x4f0   :  { %1671 = vrcp.f32 %v630_v20 }
 0x4f1   :  { %1673 = vrcp.f32 %v633_v21 }
 0x4f3   :  { %v639_v26 = vpop.xlane.xlu1 %638 }
 0x4f7   :  { %v225_v32 = vpop.permute.xlu1 %224 }
 0x4f8   :  { %v1584_v38 = vpack.c.bf16 %v225_v32, %v1343_v30 }
 0x4fa   :  { %v1672_v22 = vpop.eup %1671 }
 0x4fb   :  { %v660_v23 = vmul.f32 %v1672_v22, %v1658_v54  ;;  %v1674_v35 = vpop.eup %1673 }
 0x4fc   :  { %v645_v24 = vpop.xlane.xlu0 %644  ;;  %v661_v40 = vmul.f32 %v1674_v35, %v1894_v52 }
 0x4fd   :  { %1483 = vmatprep.mubr.msk.f32.mxu1 %vm579_vm3, %v660_v23 }
 0x500   :  { %v642_v25 = vpop.xlane.xlu0 %641 }
 0x501   :  { %1675 = vrcp.f32 %v642_v25  ;;  %v1370_v25 = vld [vmem:[%s2049_s4 + $0x2] ss:$0 sm:$0xff] }
 0x502   :  { %1677 = vrcp.f32 %v639_v26 }
 0x504   :  { %v636_v27 = vpop.xlane.xlu0 %635 }
 0x505   :  { %1679 = vrcp.f32 %v636_v27 }
 0x506   :  { %1681 = vrcp.f32 %v645_v24 }
 0x508   :  { %v223_v33 = vpop.permute.xlu0 %222 }
 0x509   :  { %v1580_v34 = vpack.c.bf16 %v223_v33, %v1342_v29 }
 0x50b   :  { %v1676_v36 = vpop.eup %1675  ;;  %1581 = vmatprep.subr.bf16.mxu1 %v1580_v34 }
 0x50c   :  { %1583 = vmatpush3.bf16.msra.mxu1 %v1580_v34  ;;  %v664_v39 = vmul.f32 %v1676_v36, %v1664_v3  ;;  %v1678_v42 = vpop.eup %1677 }
 0x50d   :  { %1585 = vmatprep.subr.bf16.mxu1 %v1584_v38  ;;  %v663_v45 = vmul.f32 %v1678_v42, %v1899_v60  ;;  %v39_v42 = vld [vmem:[%s2048_s3 + $0x70] sm:$0xff] }
 0x50e   :  { %1497 = vmatprep.mubr.msk.f32.mxu0 %vm579_vm3, %v664_v39  ;;  %v38_v39 = vld [vmem:[%s2048_s3 + $0x50] sm:$0xff] }
 0x50f   :  { %v1680_v43 = vpop.eup %1679  ;;  %1484 = vmatmul.mubr.msk.f32.vlgmr.msra.gmra.mrb[6].mxu1 %vm579_vm3, %v661_v40 }
 0x510   :  { %1587 = vmatpush3.bf16.msra.mxu1 %v1584_v38  ;;  %v662_v44 = vmul.f32 %v1680_v43, %v1666_v5  ;;  %v1682_v55 = vpop.eup %1681  ;;  %v1608_v43 = vpack.c.bf16 %v39_v42, %v38_v39 }
 0x511   :  { %v665_v58 = vmul.f32 %v1682_v55, %v1903_v63 }
 0x512   :  { %1490 = vmatprep.mubr.msk.f32.mxu1 %vm579_vm3, %v662_v44 }
 0x513   :  { %1491 = vmatmul.mubr.msk.f32.vlgmr.msra.gmra.mrb[8].mxu1 %vm579_vm3, %v663_v45 }
 0x528   :  { %v651_v46 = vpop.xlane.xlu1 %650 }
 0x529   :  { %1683 = vrcp.f32 %v651_v46 }
 0x52c   :  { %v648_v47 = vpop.xlane.xlu1 %647 }
 0x52d   :  { %1685 = vrcp.f32 %v648_v47 }
 0x530   :  { %v1648_v50 = vpop.permute.xlu1 %1647 }
 0x531   :  { %v1650_v51 = vunpack.i.h.bf16 %v1648_v50  ;;  %v1649_v52 = vunpack.i.l.bf16 %v1648_v50 }
 0x533   :  { %v1592_v53 = vpack.c.bf16 %v1650_v51, %v1345_v49  ;;  %v1588_v54 = vpack.c.bf16 %v1649_v52, %v1344_v48  ;;  %v1684_v56 = vpop.eup %1683  ;;  %v1373_v52 = vld [vmem:[%s2049_s4 + $0x3] ss:$0 sm:$0xff] }
 0x534   :  { %v667_v60 = vmul.f32 %v1684_v56, %v1911_v14 }
 0x535   :  { %1589 = vmatprep.subr.bf16.mxu0 %v1588_v54  ;;  %1593 = vmatprep.subr.bf16.mxu1 %v1592_v53 }
 0x536   :  { %1591 = vmatpush3.bf16.msra.mxu0 %v1588_v54  ;;  %1595 = vmatpush3.bf16.msra.mxu1 %v1592_v53 }
 0x537   :  { %v1686_v57 = vpop.eup %1685  ;;  %1597 = vmatprep.subr.bf16.mxu0 %v1596_v2 }
 0x538   :  { %v666_v59 = vmul.f32 %v1686_v57, %v1915_v16  ;;  %v40_v57 = vld [vmem:[%s2048_s3 + $0x18] sm:$0xff] }
 0x539   :  { %1498 = vmatmul.mubr.msk.f32.vlgmr.msra.gmra.mrb[4].mxu0 %vm579_vm3, %v665_v58  ;;  %v41_v58 = vld [vmem:[%s2048_s3 + $0x38] sm:$0xff] }
 0x53a   :  { %1504 = vmatprep.mubr.msk.f32.mxu1 %vm579_vm3, %v666_v59  ;;  %1599 = vmatpush3.bf16.msra.mxu0 %v1596_v2  ;;  %v42_v59 = vld [vmem:[%s2048_s3 + $0x58] sm:$0xff] }
 0x53b   :  { %1505 = vmatmul.mubr.msk.f32.vlgmr.msra.gmra.mrb[10].mxu1 %vm579_vm3, %v667_v60  ;;  %1601 = vmatprep.subr.bf16.mxu0 %v1600_v8  ;;  %v1612_v60 = vpack.c.bf16 %v41_v58, %v40_v57  ;;  %v1616_v62 = vpack.c.bf16 %v43_v61, %v42_v59  ;;  %v44_v2 = vld [vmem:[%s2048_s3 + $0x98] sm:$0xff] }
 0x53e   :  { %1603 = vmatpush3.bf16.msra.mxu0 %v1600_v8 }
 0x53f   :  { %1613 = vmatprep.subr.bf16.mxu0 %v1612_v60 }
 0x5e2   :  { %v1485_v63 = vpop.f32.mrb[6].mxu1 }
 0x5e3   :  { %993 = vrot.lane.b32.xlu0 %v1485_v63, %s1704_s22  ;;  %v740_v3 = vpop.f32.mrb[7].mxu1  ;;  %v45_v63 = vld [vmem:[%s2048_s3 + $0xb8] sm:$0xff] }
 0x5e6   :  { %v1492_v4 = vpop.f32.mrb[8].mxu1 }
 0x5e7   :  { %1001 = vrot.lane.b32.xlu1 %v1492_v4, %s1705_s23  ;;  %v821_v5 = vpop.f32.mrb[9].mxu1  ;;  %v46_v4 = vld [vmem:[%s2048_s3 + $0xd8] sm:$0xff] }
 0x5eb   :  { %997 = vrot.lane.b32.xlu1 %v821_v5, %s1706_s24  ;;  %v47_v5 = vld [vmem:[%s2048_s3 + $0xf8] sm:$0xff] }
 0x5ec   :  { %v1624_v6 = vpack.c.bf16 %v47_v5, %v46_v4 }
 0x60c   :  { %v1499_v9 = vpop.f32.mrb[4].mxu0 }
 0x60d   :  { %1009 = vrot.lane.b32.xlu0 %v1499_v9, %s1704_s22  ;;  %v902_v10 = vpop.f32.mrb[5].mxu0 }
 0x60e   :  { %v1506_v11 = vpop.f32.mrb[10].mxu1 }
 0x60f   :  { %1017 = vrot.lane.b32.xlu1 %v1506_v11, %s1705_s23  ;;  %v983_v12 = vpop.f32.mrb[11].mxu1 }
 0x611   :  { %1013 = vrot.lane.b32.xlu0 %v983_v12, %s1706_s24 }
 0x655   :  { %v994_v14 = vpop.permute.xlu0 %993 }
 0x656   :  { %v1004_v15 = vsel %vm242_vm1, %v740_v3, %v994_v14  ;;  %v1620_v3 = vpack.c.bf16 %v45_v63, %v44_v2 }
 0x659   :  { %v1002_v13 = vpop.permute.xlu1 %1001 }
 0x65d   :  { %v998_v16 = vpop.permute.xlu1 %997 }
 0x65e   :  { %v1005_v17 = vsel %vm579_vm3, %v1004_v15, %v998_v16 }
 0x65f   :  { %v1007_v18 = vsel %vm1006_vm4, %v1005_v17, %v1002_v13 }
 0x660   :  { %1515 = vmatprep.mubr.msk.f32.mxu0 %vm50_vm0, %v1007_v18 }
 0x67f   :  { %v1010_v19 = vpop.permute.xlu0 %1009 }
 0x680   :  { %v1020_v20 = vsel %vm242_vm1, %v902_v10, %v1010_v19 }
 0x681   :  { %v1018_v22 = vpop.permute.xlu1 %1017 }
 0x683   :  { %v1014_v21 = vpop.permute.xlu0 %1013 }
 0x684   :  { %v1021_v23 = vsel %vm579_vm3, %v1020_v20, %v1014_v21 }
 0x685   :  { %v1022_v24 = vsel %vm1006_vm4, %v1021_v23, %v1018_v22 }
 0x686   :  { %1516 = vmatmul.mubr.msk.f32.vlgmr.msra.gmra.mrb[6].mxu0 %vm50_vm0, %v1022_v24 }
 0x687   :  { %1615 = vmatpush3.bf16.msra.mxu0 %v1612_v60 }
 0x688   :  { %1617 = vmatprep.subr.bf16.mxu0 %v1616_v62 }
 0x68b   :  { %1619 = vmatpush3.bf16.msra.mxu0 %v1616_v62 }
 0x68c   :  { %1621 = vmatprep.subr.bf16.mxu0 %v1620_v3 }
 0x68f   :  { %1623 = vmatpush3.bf16.msra.mxu0 %v1620_v3 }
 0x690   :  { %1625 = vmatprep.subr.bf16.mxu0 %v1624_v6 }
 0x693   :  { %1627 = vmatpush3.bf16.msra.mxu0 %v1624_v6 }
 0x759   :  { %v1517_v26 = vpop.f32.mrb[6].mxu0 }
 0x75a   :  { %v1105_v27 = vadd.f32 %v1517_v26, %v1370_v25  ;;  %v1099_v29 = vpop.f32.mrb[7].mxu0 }
 0x75b   :  { %v1100_v30 = vadd.f32 %v1370_v25, %v1099_v29  ;;  %v1377_v29 = vld [vmem:[%s2049_s4 + $0x5] ss:$0 sm:$0xff] }
 0x75c   :  { %v1967_v32 = vadd.f32 %v1105_v27, %v1745_v1  ;;  %v36_v1 = vld [vmem:[%s2048_s3 + $0x10] sm:$0xff] }
 0x75d   :  { %v1970_v33 = vadd.f32 %v1100_v30, %v1740_v0  ;;  %v37_v0 = vld [vmem:[%s2048_s3 + $0x30] sm:$0xff] }
 0x75e   :  { %v1111_v34 = vmul.f32 %v1967_v32, %v1967_v32  ;;  %v1604_v40 = vpack.c.bf16 %v37_v0, %v36_v1 }
 0x75f   :  { %v1110_v35 = vmul.f32 %v1970_v33, %v1970_v33 }
 0x760   :  { %v1115_v36 = vsel %vm50_vm0, %v1111_v34, 0.0  ;;  %1605 = vmatprep.subr.bf16.mxu1 %v1604_v40 }
 0x761   :  { %1116 = vadd.xlane.f32.xlu1 %v1115_v36  ;;  %v1112_v38 = vsel %vm50_vm0, %v1110_v35, 0.0  ;;  %1607 = vmatpush3.bf16.msra.mxu1 %v1604_v40 }
 0x762   :  { %1113 = vadd.xlane.f32.xlu0 %v1112_v38  ;;  %1609 = vmatprep.subr.bf16.mxu1 %v1608_v43 }
 0x765   :  { %1611 = vmatpush3.bf16.msra.mxu1 %v1608_v43 }
 0x7ee   :  { %v1117_v44 = vpop.xlane.xlu1 %1116 }
 0x7ef   :  { %v1119_v45 = vmul.f32 0.03125, %v1117_v44  ;;  %v1114_v46 = vpop.xlane.xlu0 %1113 }
 0x7f0   :  { %v1118_v47 = vmul.f32 0.03125, %v1114_v46 }
 0x7f1   :  { %v1121_v48 = vadd.f32 1e-06, %v1119_v45 }
 0x7f2   :  { %v1120_v49 = vadd.f32 1e-06, %v1118_v47 }
 0x7f3   :  { %1687 = vrsqrt.f32 %v1121_v48 }
 0x7f4   :  { %1689 = vrsqrt.f32 %v1120_v49 }
 0x7fd   :  { %v1688_v50 = vpop.eup %1687 }
 0x7fe   :  { %v1690_v51 = vpop.eup %1689  ;;  %v1125_v53 = vmul.f32 %v1688_v50, %v1967_v32 }
 0x7ff   :  { %v1124_v54 = vmul.f32 %v1690_v51, %v1970_v33 }
 0x800   :  { %v1131_v56 = vmul.f32 %v1373_v52, %v1125_v53 }
 0x801   :  { %v1130_v55 = vmul.f32 %v1373_v52, %v1124_v54 }
 0x803   :  { %1526 = vmatprep.mubr.msk.f32.mxu1 %vm50_vm0, %v1130_v55 }
 0x804   :  { %1527 = vmatmul.mubr.msk.f32.vlgmr.msra.gmra.mrb[12].mxu1 %vm50_vm0, %v1131_v56 }
 0x8d7   :  { %v1528_v8 = vpop.f32.mrb[12].mxu1 }
 0x8d8   :  { %v1214_v9 = vadd.f32 %v1528_v8, %v1374_v7  ;;  %v1208_v10 = vpop.f32.mrb[13].mxu1 }
 0x8d9   :  { %v1209_v11 = vadd.f32 %v1374_v7, %v1208_v10 }
 0x8da   :  { %1233 = vrot.lane.b32.xlu1 %v1214_v9, %s1701_s10  ;;  %v1218_v13 = vsub.f32 0.0, %v1214_v9 }
 0x8db   :  { %1231 = vrot.lane.b32.xlu0 %v1209_v11, %s1701_s10  ;;  %v1217_v12 = vsub.f32 0.0, %v1209_v11 }
 0x8dc   :  { %v1221_v15 = vmul.f32 1.442695, %v1218_v13 }
 0x8dd   :  { %v1219_v14 = vmul.f32 1.442695, %v1217_v12 }
 0x8df   :  { %1691 = vpow2.f32 %v1219_v14 }
 0x8e0   :  { %1693 = vpow2.f32 %v1221_v15 }
 0x8e9   :  { %v1692_v16 = vpop.eup %1691 }
 0x8ea   :  { %v1694_v17 = vpop.eup %1693  ;;  %v1223_v18 = vadd.f32 1.0, %v1692_v16 }
 0x8eb   :  { %v1224_v19 = vadd.f32 1.0, %v1694_v17 }
 0x8ec   :  { %1695 = vrcp.f32 %v1223_v18 }
 0x8ed   :  { %1697 = vrcp.f32 %v1224_v19 }
 0x8f6   :  { %v1696_v20 = vpop.eup %1695 }
 0x8f7   :  { %v1698_v21 = vpop.eup %1697  ;;  %v1227_v23 = vmul.f32 %v1696_v20, %v1209_v11 }
 0x8f8   :  { %v1228_v24 = vmul.f32 %v1698_v21, %v1214_v9 }
 0x94c   :  { %v1234_v22 = vpop.permute.xlu1 %1233 }
 0x94d   :  { %v1232_v25 = vpop.permute.xlu0 %1231  ;;  %v1238_v27 = vmul.f32 %v1234_v22, %v1228_v24 }
 0x94e   :  { %v1237_v26 = vmul.f32 %v1232_v25, %v1227_v23 }
 0x950   :  { %1545 = vmatprep.mubr.msk.f32.mxu0 %vm1243_vm5, %v1237_v26 }
 0x951   :  { %1546 = vmatmul.mubr.msk.f32.vlgmr.msra.gmra.mrb[8].mxu0 %vm1243_vm5, %v1238_v27 }
 0xa24   :  { %v1547_v30 = vpop.f32.mrb[8].mxu0 }
 0xa25   :  { %v1322_v34 = vadd.f32 %v1547_v30, %v1377_v29  ;;  %v1316_v35 = vpop.f32.mrb[9].mxu0 }
 0xa26   :  { %v1317_v36 = vadd.f32 %v1377_v29, %v1316_v35 }
 0xa27   :  { %v1326_v38 = vadd.f32 %v1322_v34, %v1967_v32 }
 0xa28   :  { %v1325_v1 = vadd.f32 %v1317_v36, %v1970_v33 }
 0xa29   :  { %v1328_v0 = vsel %vm50_vm0, %v1326_v38, %v1799_v41 }
 0xa2a   :  { %v1331_v39 = vsel %vm1329_vm6, %v1328_v0, %v1785_v31  ;;  %v1327_v40 = vsel %vm50_vm0, %v1325_v1, %v1792_v37 }
 0xa2b   :  { %1333 = vst.msk [vmem:[%s2052_s5 + $0x8] sm:$0xff] %vm1243_vm5, %v1331_v39  ;;  %v1330_v42 = vsel %vm1329_vm6, %v1327_v40, %v1781_v28 }
 0xa2c   :  { %1332 = vst.msk [vmem:[%s2052_s5] sm:$0xff] %vm1243_vm5, %v1330_v42 }

</bundles_post_ra>
